<compile_context>
chip_gen: v5e
topology: v5e:2x2
jax: 0.10.0
libtpu: 0.0.40
codegen_flags: <defaults>
</compile_context>

<pallas_src>
import functools

import jax
import jax.numpy as jnp
from jax.experimental import pallas as pl
from jax.experimental.pallas import tpu as pltpu

DROPOUT_P = 0.3
KEEP_P = 1.0 - DROPOUT_P
# keep iff bits < KEEP_P * 2**32  (exact uint32 threshold, pure integer compare)
KEEP_THRESHOLD = int(round(KEEP_P * (1 << 32)))
INV_KEEP = float(1.0 / KEEP_P)

LANE = 128
SUBLANE = 8


def _round_up(n, m):
    return ((n + m - 1) // m) * m


def _expert_kernel(*refs, apply_dropout, dot_dtype):
    if apply_dropout:
        x_ref, bits_ref, w1_ref, b1_ref, w2_ref, b2_ref, o_ref = refs
    else:
        x_ref, w1_ref, b1_ref, w2_ref, b2_ref, o_ref = refs
        bits_ref = None

    # fc1: [bm, I] @ [I, H] + [1, H]
    x = x_ref[...]
    w1 = w1_ref[...]
    if dot_dtype != jnp.float32:
        x = x.astype(dot_dtype)
        w1 = w1.astype(dot_dtype)
    h = jnp.dot(x, w1, preferred_element_type=jnp.float32) + b1_ref[...]
    # ReLU
    h = jnp.maximum(h, 0.0)

    if apply_dropout:
        # Dropout(p=0.3), training mode: zero with prob p, scale survivors by
        # 1/(1-p). Single uint32 compare per element.
        keep = bits_ref[...] < jnp.uint32(KEEP_THRESHOLD)
        h = jnp.where(keep, h * INV_KEEP, 0.0)

    # fc2: [bm, H] @ [H, O] + [1, O]
    w2 = w2_ref[...]
    if dot_dtype != jnp.float32:
        h = h.astype(dot_dtype)
        w2 = w2.astype(dot_dtype)
    out = jnp.dot(h, w2, preferred_element_type=jnp.float32) + b2_ref[...]
    o_ref[...] = out.astype(o_ref.dtype)


def expert_forward(x, w1, b1, w2, b2, *, dropout_bits=None, apply_dropout=True,
                   block_m=256, dot_dtype=jnp.float32):
    """x: [B, input_size] f32. w1: [I, H], w2: [H, O] (pre-transposed vs torch).

    dropout_bits: uint32 [B, H] random bits (required when apply_dropout=True).
    Returns [B, output_size] f32.
    """
    B, I = x.shape
    assert w1.shape[0] == I
    H = w1.shape[1]
    assert w2.shape[0] == H
    O = w2.shape[1]

    # Lane-dense padding (feature dims -> multiples of 128, batch -> mult. of 8).
    I_p = _round_up(I, LANE)
    H_p = _round_up(H, LANE)
    O_p = _round_up(O, LANE)
    bm = min(block_m, _round_up(B, SUBLANE))
    bm = _round_up(bm, SUBLANE)
    B_p = _round_up(B, bm)

    def pad2(a, r, c):
        return jnp.pad(a, ((0, r - a.shape[0]), (0, c - a.shape[1])))

    x_p = pad2(x.astype(jnp.float32), B_p, I_p)
    w1_p = pad2(w1.astype(jnp.float32), I_p, H_p)
    b1_p = pad2(b1.reshape(1, -1).astype(jnp.float32), 1, H_p)
    w2_p = pad2(w2.astype(jnp.float32), H_p, O_p)
    b2_p = pad2(b2.reshape(1, -1).astype(jnp.float32), 1, O_p)

    grid = (B_p // bm,)

    in_specs = [pl.BlockSpec((bm, I_p), lambda i: (i, 0))]          # x: batch-tiled
    args = [x_p]
    if apply_dropout:
        if dropout_bits is None:
            raise ValueError("dropout_bits (uint32 [B, H]) is required when apply_dropout=True")
        bits_p = pad2(dropout_bits.astype(jnp.uint32), B_p, H_p)
        in_specs.append(pl.BlockSpec((bm, H_p), lambda i: (i, 0)))  # bits: batch-tiled
        args.append(bits_p)
    in_specs += [
        pl.BlockSpec((I_p, H_p), lambda i: (0, 0)),  # w1: resident across batch tiles
        pl.BlockSpec((1, H_p), lambda i: (0, 0)),    # b1
        pl.BlockSpec((H_p, O_p), lambda i: (0, 0)),  # w2: resident
        pl.BlockSpec((1, O_p), lambda i: (0, 0)),    # b2
    ]
    args += [w1_p, b1_p, w2_p, b2_p]

    kernel = functools.partial(_expert_kernel, apply_dropout=apply_dropout,
                               dot_dtype=dot_dtype)

    flops = 2 * B_p * (I_p * H_p + H_p * O_p)
    bytes_accessed = 4 * (B_p * I_p + I_p * H_p + H_p + H_p * O_p + O_p + B_p * O_p)
    if apply_dropout:
        bytes_accessed += 4 * B_p * H_p

    out_p = pl.pallas_call(
        kernel,
        out_shape=jax.ShapeDtypeStruct((B_p, O_p), jnp.float32),
        grid=grid,
        in_specs=in_specs,
        out_specs=pl.BlockSpec((bm, O_p), lambda i: (i, 0)),
        compiler_params=pltpu.CompilerParams(dimension_semantics=("parallel",)),
        cost_estimate=pl.CostEstimate(flops=flops, transcendentals=0,
                                      bytes_accessed=bytes_accessed),
    )(*args)

    return out_p[:B, :O]


def init_expert_params(key, input_size, hidden_size, output_size):
    """Deterministic init mirroring torch.nn.Linear default (uniform +-1/sqrt(fan_in))."""
    k1, k2, k3, k4 = jax.random.split(key, 4)
    bound1 = 1.0 / (input_size ** 0.5)
    bound2 = 1.0 / (hidden_size ** 0.5)
    # Stored transposed relative to PyTorch ([out, in] -> [in, out]).
    w1 = jax.random.uniform(k1, (input_size, hidden_size), jnp.float32, -bound1, bound1)
    b1 = jax.random.uniform(k2, (hidden_size,), jnp.float32, -bound1, bound1)
    w2 = jax.random.uniform(k3, (hidden_size, output_size), jnp.float32, -bound2, bound2)
    b2 = jax.random.uniform(k4, (output_size,), jnp.float32, -bound2, bound2)
    return w1, b1, w2, b2


if __name__ == "__main__":
    key = jax.random.PRNGKey(0)
    kx, kp, kd = jax.random.split(key, 3)

    batch = 8
    input_size = 32
    hidden_size = 64
    output_size = 16

    x = jax.random.normal(kx, (batch, input_size), dtype=jnp.float32)
    w1, b1, w2, b2 = init_expert_params(kp, input_size, hidden_size, output_size)

    # Training-mode forward: dropout mask derived from a deterministic uint32 stream.
    # TODO(synk): mask is drawn from jax.random, not torch's RNG stream, so it is not
    # bit-identical to torch.nn.Dropout; semantics (p=0.3, 1/0.7 scaling) match.
    bits = jax.random.bits(kd, (batch, hidden_size), jnp.uint32)
    out_train = expert_forward(x, w1, b1, w2, b2, dropout_bits=bits, apply_dropout=True)
    out_train = jax.block_until_ready(out_train)

    # Eval-mode forward (dropout is identity).
    out_eval = expert_forward(x, w1, b1, w2, b2, apply_dropout=False)
    out_eval = jax.block_until_ready(out_eval)

    # bf16-MXU fast path (v6e/v7x); sanity check only.
    out_bf16 = expert_forward(x, w1, b1, w2, b2, apply_dropout=False,
                              dot_dtype=jnp.bfloat16)
    out_bf16 = jax.block_until_ready(out_bf16)

    # Pure-JAX references (HIGHEST precision matmuls). Tolerance is loose enough
    # to absorb any reduced-precision f32 matmul defaults on real TPU hardware.
    hp = jax.lax.Precision.HIGHEST
    h_ref = jnp.maximum(jnp.dot(x, w1, precision=hp) + b1, 0.0)
    keep_ref = bits < jnp.uint32(KEEP_THRESHOLD)
    h_drop = jnp.where(keep_ref, h_ref * INV_KEEP, 0.0)
    ref_train = jnp.dot(h_drop, w2, precision=hp) + b2
    ref_eval = jnp.dot(h_ref, w2, precision=hp) + b2

    assert out_train.shape == (batch, output_size)
    assert out_eval.shape == (batch, output_size)
    assert out_bf16.shape == (batch, output_size)
    assert bool(jnp.all(jnp.isfinite(out_train)))
    assert bool(jnp.all(jnp.isfinite(out_bf16)))
    assert bool(jnp.allclose(out_train, ref_train, atol=2e-2, rtol=2e-2))
    assert bool(jnp.allclose(out_eval, ref_eval, atol=2e-2, rtol=2e-2))
    print("KERNEL_OK")
</pallas_src>

<mosaic_0001>
module attributes {stable_mosaic.version = 11 : i64} {
  func.func @_expert_kernel(%arg0: i32, %arg1: memref<8x128xf32, #tpu.memory_space<vmem>>, %arg2: memref<8x128xi32, #tpu.memory_space<vmem>>, %arg3: memref<128x128xf32, #tpu.memory_space<vmem>>, %arg4: memref<1x128xf32, #tpu.memory_space<vmem>>, %arg5: memref<128x128xf32, #tpu.memory_space<vmem>>, %arg6: memref<1x128xf32, #tpu.memory_space<vmem>>, %arg7: memref<8x128xf32, #tpu.memory_space<vmem>>) attributes {dimension_semantics = [#tpu.dimension_semantics<parallel>], iteration_bounds = array<i64: 1>, scalar_prefetch = 0 : i64, scratch_operands = 0 : i64, tpu.core_type = #tpu.core_type<tc>, window_params = [{transform_indices = @transform_0, window_bounds = array<i64: 8, 128>}, {transform_indices = @transform_1, window_bounds = array<i64: 8, 128>}, {pipeline_mode = #tpu.pipeline_mode<synchronous>, transform_indices = @transform_2, window_bounds = array<i64: 128, 128>}, {pipeline_mode = #tpu.pipeline_mode<synchronous>, transform_indices = @transform_3, window_bounds = array<i64: 1, 128>}, {pipeline_mode = #tpu.pipeline_mode<synchronous>, transform_indices = @transform_4, window_bounds = array<i64: 128, 128>}, {pipeline_mode = #tpu.pipeline_mode<synchronous>, transform_indices = @transform_5, window_bounds = array<i64: 1, 128>}, {transform_indices = @transform_6, window_bounds = array<i64: 8, 128>}]} {
    %c0 = arith.constant 0 : index
    %c0_0 = arith.constant 0 : index
    %0 = vector.load %arg1[%c0, %c0_0] : memref<8x128xf32, #tpu.memory_space<vmem>>, vector<8x128xf32>
    %c0_1 = arith.constant 0 : index
    %c0_2 = arith.constant 0 : index
    %1 = vector.load %arg3[%c0_1, %c0_2] : memref<128x128xf32, #tpu.memory_space<vmem>>, vector<128x128xf32>
    %cst = arith.constant dense<0.000000e+00> : vector<8x128xf32>
    %2 = tpu.matmul %0, %1, %cst {dimension_numbers = #tpu.dot_dimension_numbers<[1], [0], [0], [1], [0, 0, 1, 1], [], []>} : vector<8x128xf32>, vector<128x128xf32>, vector<8x128xf32> -> vector<8x128xf32>
    %c0_3 = arith.constant 0 : index
    %c0_4 = arith.constant 0 : index
    %3 = vector.load %arg4[%c0_3, %c0_4] : memref<1x128xf32, #tpu.memory_space<vmem>>, vector<1x128xf32>
    %4 = vector.broadcast %3 : vector<1x128xf32> to vector<8x128xf32>
    %5 = arith.addf %2, %4 : vector<8x128xf32>
    %cst_5 = arith.constant 0.000000e+00 : f32
    %6 = vector.broadcast %cst_5 : f32 to vector<8x128xf32>
    %7 = arith.maximumf %5, %6 : vector<8x128xf32>
    %c0_6 = arith.constant 0 : index
    %c0_7 = arith.constant 0 : index
    %8 = vector.load %arg2[%c0_6, %c0_7] : memref<8x128xi32, #tpu.memory_space<vmem>>, vector<8x128xi32>
    %c-1288490189_i32 = arith.constant -1288490189 : i32
    %9 = vector.broadcast %c-1288490189_i32 : i32 to vector<8x128xi32>
    %10 = arith.cmpi ult, %8, %9 : vector<8x128xi32>
    %cst_8 = arith.constant 1.42857146 : f32
    %11 = vector.broadcast %cst_8 : f32 to vector<8x128xf32>
    %12 = arith.mulf %7, %11 : vector<8x128xf32>
    %cst_9 = arith.constant 0.000000e+00 : f32
    %13 = vector.broadcast %cst_9 : f32 to vector<8x128xf32>
    %14 = arith.select %10, %12, %13 : vector<8x128xi1>, vector<8x128xf32>
    %c0_10 = arith.constant 0 : index
    %c0_11 = arith.constant 0 : index
    %15 = vector.load %arg5[%c0_10, %c0_11] : memref<128x128xf32, #tpu.memory_space<vmem>>, vector<128x128xf32>
    %cst_12 = arith.constant dense<0.000000e+00> : vector<8x128xf32>
    %16 = tpu.matmul %14, %15, %cst_12 {dimension_numbers = #tpu.dot_dimension_numbers<[1], [0], [0], [1], [0, 0, 1, 1], [], []>} : vector<8x128xf32>, vector<128x128xf32>, vector<8x128xf32> -> vector<8x128xf32>
    %c0_13 = arith.constant 0 : index
    %c0_14 = arith.constant 0 : index
    %17 = vector.load %arg6[%c0_13, %c0_14] : memref<1x128xf32, #tpu.memory_space<vmem>>, vector<1x128xf32>
    %18 = vector.broadcast %17 : vector<1x128xf32> to vector<8x128xf32>
    %19 = arith.addf %16, %18 : vector<8x128xf32>
    %c0_15 = arith.constant 0 : index
    %c0_16 = arith.constant 0 : index
    %20 = vector.load %arg7[%c0_15, %c0_16] : memref<8x128xf32, #tpu.memory_space<vmem>>, vector<8x128xf32>
    tpu.vector_store %arg7[%c0_15, %c0_16], %19 {strides = array<i32>} : memref<8x128xf32, #tpu.memory_space<vmem>>, vector<8x128xf32>,
    return
  }
  func.func @transform_0(%arg0: i32) -> (i32, i32) {
    %c0_i32 = arith.constant 0 : i32
    %c0_i32_0 = arith.constant 0 : i32
    return %arg0, %c0_i32 : i32, i32
  }
  func.func @transform_1(%arg0: i32) -> (i32, i32) {
    %c0_i32 = arith.constant 0 : i32
    %c0_i32_0 = arith.constant 0 : i32
    return %arg0, %c0_i32 : i32, i32
  }
  func.func @transform_2(%arg0: i32) -> (i32, i32) {
    %c0_i32 = arith.constant 0 : i32
    %c0_i32_0 = arith.constant 0 : i32
    %c0_i32_1 = arith.constant 0 : i32
    return %c0_i32, %c0_i32_0 : i32, i32
  }
  func.func @transform_3(%arg0: i32) -> (i32, i32) {
    %c0_i32 = arith.constant 0 : i32
    %c0_i32_0 = arith.constant 0 : i32
    %c0_i32_1 = arith.constant 0 : i32
    return %c0_i32, %c0_i32_0 : i32, i32
  }
  func.func @transform_4(%arg0: i32) -> (i32, i32) {
    %c0_i32 = arith.constant 0 : i32
    %c0_i32_0 = arith.constant 0 : i32
    %c0_i32_1 = arith.constant 0 : i32
    return %c0_i32, %c0_i32_0 : i32, i32
  }
  func.func @transform_5(%arg0: i32) -> (i32, i32) {
    %c0_i32 = arith.constant 0 : i32
    %c0_i32_0 = arith.constant 0 : i32
    %c0_i32_1 = arith.constant 0 : i32
    return %c0_i32, %c0_i32_0 : i32, i32
  }
  func.func @transform_6(%arg0: i32) -> (i32, i32) {
    %c0_i32 = arith.constant 0 : i32
    %c0_i32_0 = arith.constant 0 : i32
    return %arg0, %c0_i32 : i32, i32
  }
}

</mosaic_0001>

<bundles_post_ra>
// kernel: tpu_custom_call.1
= control target key start
LH: loop header
LB: loop body
LE: loop exit
PB: predicated region body
PF: predicated region fallthrough
CT: control target
= control target key end

     0   :  { %11 = vsyncpa [#allocation3], 0  ;;  %s393_s0 = inlined_call_operand.hbm [shape: f32[8,128], index: 0, kind: input, shape index: {}]   ;;  %s394_s1 = inlined_call_operand.hbm [shape: u32[8,128], index: 1, kind: input, shape index: {}]   ;;  %s395_s2 = inlined_call_operand.hbm [shape: f32[128,128], index: 2, kind: input, shape index: {}]   ;;  %s396_s3 = inlined_call_operand.vmem [shape: f32[1,128], index: 3, kind: input, shape index: {}]   ;;  %s397_s4 = inlined_call_operand.hbm [shape: f32[128,128], index: 4, kind: input, shape index: {}]   ;;  %s398_s5 = inlined_call_operand.vmem [shape: f32[1,128], index: 5, kind: input, shape index: {}]   ;;  %s399_s6 = inlined_call_operand.hbm [shape: f32[8,128], index: 6, kind: output, shape index: {}]  }
   0x1   :  { %12 = vsyncpa [#allocation6], 0 }
   0x2   :  { %13 = vsyncpa [#allocation9], 0  ;;  %s31_s23 = sshll.u32 %s394_s1, 4  ;;  %s32_s23 = int_to_ptr.hbm [resolvable:$true] %s31_s23 }
   0x3   :  { %14 = vsyncpa [#allocation4], 0  ;;  %s330_s24 = smov [#allocation5]   ;;  %s20_s28 = sshll.u32 %s393_s0, 4  ;;  %s21_s28 = int_to_ptr.hbm [resolvable:$true] %s20_s28 }
   0x4   :  { %s33_s25 = sshll.u32 %s330_s24, 4  ;;  %s331_s29 = smov [#allocation2]   ;;  %s34_s25 = int_to_ptr.vmem [resolvable:$true] %s33_s25 }
   0x5   :  { %36 = dma.hbm_to_vmem [thread:$0]  %s32_s23, 128, %s34_s25, [#allocation6]  }
   0x6   :  { %s22_s30 = sshll.u32 %s331_s29, 4  ;;  %s41_s9 = sshll.u32 %s395_s2, 4  ;;  %s23_s30 = int_to_ptr.vmem [resolvable:$true] %s22_s30  ;;  %s42_s9 = int_to_ptr.hbm [resolvable:$true] %s41_s9 }
   0x7   :  { %25 = dma.hbm_to_vmem [thread:$0]  %s21_s28, 128, %s23_s30, [#allocation3]  }
   0x8   :  { %s332_s1 = smov [#allocation7]   ;;  %s56_s13 = sshll.u32 %s397_s4, 4  ;;  %s57_s13 = int_to_ptr.hbm [resolvable:$true] %s56_s13 }
   0x9   :  { %s43_s10 = sshll.u32 %s332_s1, 4  ;;  %s333_s14 = smov 128   ;;  %s44_s10 = int_to_ptr.vmem [resolvable:$true] %s43_s10 }
   0xa   :  { %s334_s0 = smov 8   ;;  %s335_s15 = smov [#allocation8]  }
   0xb   :  { %49 = dma.hbm_to_vmem [thread:$0]  %s42_s9, 2048, %s44_s10, [#allocation6], %s333_s14, %s333_s14, %s334_s0  }
   0xc   :  { %s58_s16 = sshll.u32 %s335_s15, 4  ;;  %s59_s16 = int_to_ptr.vmem [resolvable:$true] %s58_s16 }
   0xd   :  { %64 = dma.hbm_to_vmem [thread:$0]  %s57_s13, 2048, %s59_s16, [#allocation9], %s333_s14, %s333_s14, %s334_s0  }
   0xe   :  { %322 = dma.done.wait [#allocation3], 128  }
   0xf   :  { %323 = vsyncadd [#allocation3], 4294967168 }
  0x10   :  { %324 = dma.done.wait [#allocation6], 2176  }
  0x11   :  { %325 = vsyncadd [#allocation6], 4294965120 }
  0x12   :  { %326 = dma.done.wait [#allocation9], 2048  }
  0x13   :  { %327 = vsyncadd [#allocation9], 4294965248  ;;  %v99_v0 = vld [vmem:[#allocation7 + $0x78] sm:$0xff]  ;;  %v98_v1 = vld [vmem:[#allocation7 + $0x70] sm:$0xff]  ;;  %s336_s19 = smov [#allocation10]   ;;  %s179_s23 = sshll.u32 %s399_s6, 4  ;;  %s180_s23 = int_to_ptr.hbm [resolvable:$true] %s179_s23 }
  0x14   :  { %104 = vmatpush.msra.mxu0 %v99_v0  ;;  %v97_v2 = vld [vmem:[#allocation7 + $0x68] sm:$0xff]  ;;  %v96_v3 = vld [vmem:[#allocation7 + $0x60] sm:$0xff]  ;;  %v146_v4 = vld [vmem:[#allocation8 + $0x78] sm:$0xff]  ;;  %s177_s20 = sshll.u32 %s336_s19, 4  ;;  %s178_s20 = int_to_ptr.vmem [resolvable:$true] %s177_s20 }
  0x15   :  { %v95_v5 = vld [vmem:[#allocation7 + $0x58] sm:$0xff]  ;;  %151 = vmatpush.msra.mxu1 %v146_v4  ;;  %v145_v6 = vld [vmem:[#allocation8 + $0x70] sm:$0xff]  ;;  %v144_v7 = vld [vmem:[#allocation8 + $0x68] sm:$0xff] }
  0x16   :  { %105 = vmatpush.msra.mxu0 %v98_v1  ;;  %v94_v8 = vld [vmem:[#allocation7 + $0x50] sm:$0xff]  ;;  %v143_v9 = vld [vmem:[#allocation8 + $0x60] sm:$0xff]  ;;  %v93_v10 = vld [vmem:[#allocation7 + $0x48] sm:$0xff] }
  0x17   :  { %152 = vmatpush.msra.mxu1 %v145_v6  ;;  %v142_v11 = vld [vmem:[#allocation8 + $0x58] sm:$0xff]  ;;  %v92_v12 = vld [vmem:[#allocation7 + $0x40] sm:$0xff]  ;;  %v141_v13 = vld [vmem:[#allocation8 + $0x50] sm:$0xff] }
  0x18   :  { %106 = vmatpush.msra.mxu0 %v97_v2  ;;  %v91_v14 = vld [vmem:[#allocation7 + $0x38] sm:$0xff]  ;;  %v140_v15 = vld [vmem:[#allocation8 + $0x48] sm:$0xff]  ;;  %v90_v16 = vld [vmem:[#allocation7 + $0x30] sm:$0xff] }
  0x19   :  { %153 = vmatpush.msra.mxu1 %v144_v7  ;;  %v139_v17 = vld [vmem:[#allocation8 + $0x40] sm:$0xff]  ;;  %v89_v18 = vld [vmem:[#allocation7 + $0x28] sm:$0xff]  ;;  %v138_v19 = vld [vmem:[#allocation8 + $0x38] sm:$0xff] }
  0x1a   :  { %107 = vmatpush.msra.mxu0 %v96_v3  ;;  %v88_v20 = vld [vmem:[#allocation7 + $0x20] sm:$0xff]  ;;  %v137_v21 = vld [vmem:[#allocation8 + $0x30] sm:$0xff]  ;;  %v87_v22 = vld [vmem:[#allocation7 + $0x18] sm:$0xff] }
  0x1b   :  { %154 = vmatpush.msra.mxu1 %v143_v9  ;;  %v136_v23 = vld [vmem:[#allocation8 + $0x28] sm:$0xff]  ;;  %v86_v24 = vld [vmem:[#allocation7 + $0x10] sm:$0xff]  ;;  %v135_v25 = vld [vmem:[#allocation8 + $0x20] sm:$0xff] }
  0x1c   :  { %108 = vmatpush.msra.mxu0 %v95_v5  ;;  %v85_v26 = vld [vmem:[#allocation7 + $0x8] sm:$0xff]  ;;  %v84_v27 = vld [vmem:[#allocation7] sm:$0xff]  ;;  %v83_v28 = vld [vmem:[#allocation2] sm:$0xff] }
  0x1d   :  { %155 = vmatpush.msra.mxu1 %v142_v11  ;;  %v134_v29 = vld [vmem:[#allocation8 + $0x18] sm:$0xff]  ;;  %v133_v30 = vld [vmem:[#allocation8 + $0x10] sm:$0xff]  ;;  %v132_v31 = vld [vmem:[#allocation8 + $0x8] sm:$0xff] }
  0x1e   :  { %109 = vmatpush.msra.mxu0 %v94_v8  ;;  %v131_v32 = vld [vmem:[#allocation8] sm:$0xff]  ;;  %v200_v33 = vld [vmem:[%s396_s3] ss:$0 sm:$0xff]  ;;  %v125_v34 = vld [vmem:[#allocation5] sm:$0xff] }
  0x1f   :  { %156 = vmatpush.msra.mxu1 %v141_v13  ;;  %v191_v36 = vxor.u32 2147483648, %v125_v34  ;;  %v201_v40 = vld [vmem:[%s398_s5] ss:$0 sm:$0xff] }
  0x20   :  { %110 = vmatpush.msra.mxu0 %v93_v10 }
  0x21   :  { %157 = vmatpush.msra.mxu1 %v140_v15  ;;  %vm128_vm0 = vcmp.lt.s32.totalorder %v191_v36, 858993459 }
  0x22   :  { %111 = vmatpush.msra.mxu0 %v92_v12 }
  0x23   :  { %158 = vmatpush.msra.mxu1 %v139_v17 }
  0x24   :  { %112 = vmatpush.msra.mxu0 %v91_v14 }
  0x25   :  { %159 = vmatpush.msra.mxu1 %v138_v19 }
  0x26   :  { %113 = vmatpush.msra.mxu0 %v90_v16 }
  0x27   :  { %160 = vmatpush.msra.mxu1 %v137_v21 }
  0x28   :  { %114 = vmatpush.msra.mxu0 %v89_v18 }
  0x29   :  { %161 = vmatpush.msra.mxu1 %v136_v23 }
  0x2a   :  { %115 = vmatpush.msra.mxu0 %v88_v20 }
  0x2b   :  { %162 = vmatpush.msra.mxu1 %v135_v25 }
  0x2c   :  { %116 = vmatpush.msra.mxu0 %v87_v22 }
  0x2d   :  { %163 = vmatpush.msra.mxu1 %v134_v29 }
  0x2e   :  { %117 = vmatpush.msra.mxu0 %v86_v24 }
  0x2f   :  { %164 = vmatpush.msra.mxu1 %v133_v30 }
  0x30   :  { %118 = vmatpush.msra.mxu0 %v85_v26 }
  0x31   :  { %165 = vmatpush.msra.mxu1 %v132_v31 }
  0x32   :  { %119 = vmatpush.msra.mxu0 %v84_v27 }
  0x33   :  { %120 = vmatmul.f32.vlgmr.msra.gmra.mxu0 %v83_v28  ;;  %166 = vmatpush.msra.mxu1 %v131_v32 }
  0xb0   :  { %v121_v35 = vpop.f32.mrf.mxu0 }
  0xb1   :  { %v122_v37 = vadd.f32 %v200_v33, %v121_v35 }
  0xb3   :  { %v124_v38 = vmax.f32 %v122_v37, 0.0 }
  0xb5   :  { %v129_v39 = vmul.f32 1.4285715, %v124_v38 }
  0xb7   :  { %192 = vmatmul.msk.f32.vlgmr.msra.gmra.mxu1 %vm128_vm0, %v129_v39 }
 0x134   :  { %v168_v41 = vpop.f32.mrf.mxu1 }
 0x135   :  { %v169_v42 = vadd.f32 %v201_v40, %v168_v41 }
 0x137   :  { %171 = vst [vmem:[#allocation10] sm:$0xff] %v169_v42 }
 0x138   :  { %182 = dma.vmem_to_hbm [thread:$0]  %s178_s20, 128, %s180_s23, [#allocation4]  }
 0x139   :  { %328 = dma.done.wait [#allocation4], 128  }
 0x13a   :  { %329 = vsyncadd [#allocation4], 4294967168 }
 0x13b   :  { %187 = vsyncpa [#allocation3], 1 }
 0x13c   :  { %188 = vsyncpa [#allocation6], 1 }
 0x13d   :  { %189 = vsyncpa [#allocation9], 1 }
 0x13e   :  { %190 = vsyncpa [#allocation4], 1 }

</bundles_post_ra>
